<compile_context>
chip_gen: v7x
topology: tpu7x:2x2x1
jax: 0.10.0
libtpu: 0.0.40
codegen_flags: <defaults>
</compile_context>

<pallas_src>
import math

import numpy as np
import jax
import jax.numpy as jnp
from jax.experimental import pallas as pl
from jax.experimental.pallas import tpu as pltpu

GAMMA = 1.5           # implemented exactly as u * sqrt(u)
ALPHA = 0.4
RADIUS = 2            # cv2 d=5  ->  radius = d // 2 = 2
SIGMA_COLOR = 0.05
SIGMA_SPACE = 50.0

COLOR_COEFF = -0.5 / (SIGMA_COLOR * SIGMA_COLOR)
SPACE_COEFF = -0.5 / (SIGMA_SPACE * SIGMA_SPACE)
# space weights per ring (squared distance 1, 2, 4) — python-time constants
SW1 = math.exp(1.0 * SPACE_COEFF)
SW2 = math.exp(2.0 * SPACE_COEFF)
SW4 = math.exp(4.0 * SPACE_COEFF)


def _round_up(v, m):
    return (v + m - 1) // m * m


def _roll(v, shift, axis):
    # pltpu.roll has jnp.roll-style modular semantics; keep the rotate amount
    # non-negative so the lowering never sees a negative shift.
    return pltpu.roll(v, shift % v.shape[axis], axis=axis)


def preproc_kernel(x_ref, o_ref):
    """x_ref: (THp, Wp) tile with the reflect-101 halo baked into the
    wrap-around layout (rows/cols ordered [0..n+1, junk, -2, -1]).
    o_ref: (TH, Wp) — the first TH rows of the tile (real output rows)."""
    x = x_ref[...].astype(jnp.float32)

    # ---- elementwise preprocessing ----
    u = jnp.clip((x + 1.0) * 0.5, 1e-6, 1.0)
    c = (1.0 - ALPHA) * u + ALPHA * (u * jnp.sqrt(u))     # u**1.5 (GAMMA == 1.5)

    # ---- neighbour images via XLU rolls (wrap lands on the baked halo) ----
    w_m1 = _roll(c, 1, 1)      # (i,   j-1)
    w_p1 = _roll(c, -1, 1)     # (i,   j+1)
    w_m2 = _roll(c, 2, 1)      # (i,   j-2)
    w_p2 = _roll(c, -2, 1)     # (i,   j+2)
    n_m1 = _roll(c, 1, 0)      # (i-1, j)
    n_p1 = _roll(c, -1, 0)     # (i+1, j)
    n_m2 = _roll(c, 2, 0)      # (i-2, j)
    n_p2 = _roll(c, -2, 0)     # (i+2, j)
    d_mm = _roll(w_m1, 1, 0)   # (i-1, j-1)
    d_mp = _roll(w_p1, 1, 0)   # (i-1, j+1)
    d_pm = _roll(w_m1, -1, 0)  # (i+1, j-1)
    d_pp = _roll(w_p1, -1, 0)  # (i+1, j+1)

    # center tap: diff == 0 -> weight exactly 1 (no exp needed)
    num = c
    den = jnp.ones_like(c)

    # Taps grouped by equal space distance so the constant space weight is
    # applied once per ring partial sum instead of once per tap.
    # TODO(synk): cv2's 32F path evaluates the colour Gaussian through a
    # linearly interpolated LUT; we use exact exp, so results match to float
    # tolerance, not bit-exactly.
    rings = (
        (SW1, (w_m1, w_p1, n_m1, n_p1)),   # di^2 + dj^2 == 1
        (SW2, (d_mm, d_mp, d_pm, d_pp)),   # == 2
        (SW4, (w_m2, w_p2, n_m2, n_p2)),   # == 4
    )
    for sw, nbrs in rings:
        r_num = jnp.zeros_like(c)
        r_den = jnp.zeros_like(c)
        for nb in nbrs:
            d = nb - c
            cw = jnp.exp(d * d * COLOR_COEFF)
            r_num = r_num + cw * nb
            r_den = r_den + cw
        num = num + sw * r_num
        den = den + sw * r_den

    # den >= 1: approximate EUP reciprocal + one Newton step -> ~f32 exact.
    inv = pl.reciprocal(den, approx=True)
    inv = inv * (2.0 - den * inv)
    out = num * inv

    th = o_ref.shape[0]
    o_ref[...] = out[:th, :].astype(o_ref.dtype)


def _reflect101(idx, n):
    idx = jnp.where(idx < 0, -idx, idx)
    idx = jnp.where(idx > n - 1, 2 * (n - 1) - idx, idx)
    return jnp.clip(idx, 0, n - 1)


def preprocessing(x):
    """x: (B, 1, H, W) float array in [-1, 1] (NCHW). Returns (B, 1, H, W)."""
    B, C, H, W = x.shape
    assert C == 1, "PreProcessing operates on single-channel images"
    assert H >= 3 and W >= 3, "reflect-101 with radius 2 needs H, W >= 3"

    img = x[:, 0, :, :]                                   # (B, H, W)

    # Lane-dense padded width (multiple of 128); the 4 halo columns are folded
    # into the wrap-around layout [0..W+1, junk, -2, -1].
    Wp = _round_up(W + 4, 128)
    # Row-tile height: multiple of 8, capped so ~24 live full-tile f32
    # temporaries stay around 24 MiB (well inside the 48 MiB VMEM limit and
    # v7x's 64 MiB physical VMEM).
    max_rows = max(8, (24 * 1024 * 1024) // (Wp * 4 * 24) // 8 * 8)
    TH = min(_round_up(H, 8), 256, max_rows)
    num_t = -(-H // TH)
    THp = _round_up(TH + 4, 8)

    # Column gather indices (shared by all tiles): [0..W+1, junk, -2, -1].
    col_offs = jnp.concatenate([
        jnp.arange(W + 2, dtype=jnp.int32),
        jnp.zeros((Wp - W - 4,), jnp.int32),
        jnp.array([-2, -1], jnp.int32),
    ])
    col_idx = _reflect101(col_offs, W)                    # (Wp,)

    # Per-tile row gather indices: real rows of the tile, 2 rows below, junk,
    # then 2 rows above at the wrap position. Interior tiles pick real
    # neighbour rows; edge tiles fall back to reflect-101.
    row_offs = jnp.concatenate([
        jnp.arange(TH + 2, dtype=jnp.int32),
        jnp.zeros((THp - TH - 4,), jnp.int32),
        jnp.array([-2, -1], jnp.int32),
    ])
    starts = jnp.arange(num_t, dtype=jnp.int32) * TH
    row_idx = _reflect101(starts[:, None] + row_offs[None, :], H)   # (num_t, THp)

    tiles = jnp.take(img, row_idx, axis=1)                # (B, num_t, THp, W)
    tiles = jnp.take(tiles, col_idx, axis=-1)             # (B, num_t, THp, Wp)
    padded = tiles.reshape(B * num_t, THp, Wp)

    n_steps = B * num_t
    out = pl.pallas_call(
        preproc_kernel,
        out_shape=jax.ShapeDtypeStruct((n_steps, TH, Wp), x.dtype),
        grid=(n_steps,),
        in_specs=[pl.BlockSpec((None, THp, Wp), lambda t: (t, 0, 0))],
        out_specs=pl.BlockSpec((None, TH, Wp), lambda t: (t, 0, 0)),
        compiler_params=pltpu.CompilerParams(
            dimension_semantics=("parallel",),
            vmem_limit_bytes=48 * 1024 * 1024,
        ),
        cost_estimate=pl.CostEstimate(
            flops=90 * n_steps * THp * Wp,
            transcendentals=14 * n_steps * THp * Wp,
            bytes_accessed=2 * x.dtype.itemsize * n_steps * THp * Wp,
        ),
    )(padded)

    out = out.reshape(B, num_t * TH, Wp)[:, :H, :W]
    return out[:, None, :, :]


def _reference(x_np):
    """Pure NumPy reference of the same math (reflect-101 bilateral filter)."""
    B, _, H, W = x_np.shape
    u = np.clip((x_np[:, 0].astype(np.float32) + 1.0) * 0.5, 1e-6, 1.0)
    blended = (1.0 - ALPHA) * u + ALPHA * np.power(u, GAMMA)
    offs = [(di, dj) for di in range(-2, 3) for dj in range(-2, 3)
            if di * di + dj * dj <= RADIUS * RADIUS]
    out = np.empty_like(blended)
    for b in range(B):
        c = blended[b]
        pad = np.pad(c, 2, mode="reflect")                # reflect-101
        num = np.zeros_like(c)
        den = np.zeros_like(c)
        for di, dj in offs:
            nb = pad[2 + di:2 + di + H, 2 + dj:2 + dj + W]
            w = (np.exp((di * di + dj * dj) * SPACE_COEFF)
                 * np.exp((nb - c) ** 2 * COLOR_COEFF))
            num += w * nb
            den += w
        out[b] = num / den
    return out[:, None]


if __name__ == "__main__":
    key = jax.random.PRNGKey(0)
    B, C, H, W = 2, 1, 16, 16
    # inputs in [-1, 1], as implied by (x + 1) / 2
    x = jax.random.uniform(key, (B, C, H, W), jnp.float32, minval=-1.0, maxval=1.0)

    y = preprocessing(x)
    jax.block_until_ready(y)

    assert y.shape == (B, C, H, W)
    assert y.dtype == x.dtype
    assert bool(jnp.all(jnp.isfinite(y)))

    ref = _reference(np.asarray(x))
    assert np.allclose(np.asarray(y, dtype=np.float32), ref, atol=1e-4, rtol=1e-3)

    print("KERNEL_OK")
</pallas_src>

<mosaic_0001>
module attributes {stable_mosaic.version = 11 : i64} {
  func.func @preproc_kernel(%arg0: i32, %arg1: memref<1x24x128xf32, #tpu.memory_space<vmem>>, %arg2: memref<1x16x128xf32, #tpu.memory_space<vmem>>) attributes {dimension_semantics = [#tpu.dimension_semantics<parallel>], iteration_bounds = array<i64: 2>, scalar_prefetch = 0 : i64, scratch_operands = 0 : i64, tpu.core_type = #tpu.core_type<tc>, window_params = [{transform_indices = @transform_0, window_bounds = array<i64: 1, 24, 128>}, {transform_indices = @transform_1, window_bounds = array<i64: 1, 16, 128>}]} {
    %c0 = arith.constant 0 : index
    %c0_0 = arith.constant 0 : index
    %c0_1 = arith.constant 0 : index
    %0 = vector.load %arg1[%c0, %c0_0, %c0_1] : memref<1x24x128xf32, #tpu.memory_space<vmem>>, vector<1x24x128xf32>
    %1 = vector.shape_cast %0 : vector<1x24x128xf32> to vector<24x128xf32>
    %cst = arith.constant 1.000000e+00 : f32
    %2 = vector.broadcast %cst : f32 to vector<24x128xf32>
    %3 = arith.addf %1, %2 : vector<24x128xf32>
    %cst_2 = arith.constant 5.000000e-01 : f32
    %4 = vector.broadcast %cst_2 : f32 to vector<24x128xf32>
    %5 = arith.mulf %3, %4 : vector<24x128xf32>
    %cst_3 = arith.constant 9.99999997E-7 : f32
    %cst_4 = arith.constant 1.000000e+00 : f32
    %6 = vector.broadcast %cst_3 : f32 to vector<24x128xf32>
    %7 = arith.maximumf %6, %5 : vector<24x128xf32>
    %8 = vector.broadcast %cst_4 : f32 to vector<24x128xf32>
    %9 = arith.minimumf %8, %7 : vector<24x128xf32>
    %cst_5 = arith.constant 6.000000e-01 : f32
    %10 = vector.broadcast %cst_5 : f32 to vector<24x128xf32>
    %11 = arith.mulf %10, %9 : vector<24x128xf32>
    %12 = math.sqrt %9 : vector<24x128xf32>
    %13 = arith.mulf %9, %12 : vector<24x128xf32>
    %cst_6 = arith.constant 4.000000e-01 : f32
    %14 = vector.broadcast %cst_6 : f32 to vector<24x128xf32>
    %15 = arith.mulf %14, %13 : vector<24x128xf32>
    %16 = arith.addf %11, %15 : vector<24x128xf32>
    %c1_i32 = arith.constant 1 : i32
    %17 = tpu.dynamic_rotate %16 by %c1_i32 dim 1 : vector<24x128xf32>, i32 -> vector<24x128xf32>
    %c127_i32 = arith.constant 127 : i32
    %18 = tpu.dynamic_rotate %16 by %c127_i32 dim 1 : vector<24x128xf32>, i32 -> vector<24x128xf32>
    %c2_i32 = arith.constant 2 : i32
    %19 = tpu.dynamic_rotate %16 by %c2_i32 dim 1 : vector<24x128xf32>, i32 -> vector<24x128xf32>
    %c126_i32 = arith.constant 126 : i32
    %20 = tpu.dynamic_rotate %16 by %c126_i32 dim 1 : vector<24x128xf32>, i32 -> vector<24x128xf32>
    %c1_i32_7 = arith.constant 1 : i32
    %21 = tpu.dynamic_rotate %16 by %c1_i32_7 dim 0 : vector<24x128xf32>, i32 -> vector<24x128xf32>
    %c23_i32 = arith.constant 23 : i32
    %22 = tpu.dynamic_rotate %16 by %c23_i32 dim 0 : vector<24x128xf32>, i32 -> vector<24x128xf32>
    %c2_i32_8 = arith.constant 2 : i32
    %23 = tpu.dynamic_rotate %16 by %c2_i32_8 dim 0 : vector<24x128xf32>, i32 -> vector<24x128xf32>
    %c22_i32 = arith.constant 22 : i32
    %24 = tpu.dynamic_rotate %16 by %c22_i32 dim 0 : vector<24x128xf32>, i32 -> vector<24x128xf32>
    %c1_i32_9 = arith.constant 1 : i32
    %25 = tpu.dynamic_rotate %17 by %c1_i32_9 dim 0 : vector<24x128xf32>, i32 -> vector<24x128xf32>
    %c1_i32_10 = arith.constant 1 : i32
    %26 = tpu.dynamic_rotate %18 by %c1_i32_10 dim 0 : vector<24x128xf32>, i32 -> vector<24x128xf32>
    %c23_i32_11 = arith.constant 23 : i32
    %27 = tpu.dynamic_rotate %17 by %c23_i32_11 dim 0 : vector<24x128xf32>, i32 -> vector<24x128xf32>
    %c23_i32_12 = arith.constant 23 : i32
    %28 = tpu.dynamic_rotate %18 by %c23_i32_12 dim 0 : vector<24x128xf32>, i32 -> vector<24x128xf32>
    %cst_13 = arith.constant 1.000000e+00 : f32
    %29 = vector.broadcast %cst_13 : f32 to vector<24x128xf32>
    %cst_14 = arith.constant 0.000000e+00 : f32
    %30 = vector.broadcast %cst_14 : f32 to vector<24x128xf32>
    %cst_15 = arith.constant 0.000000e+00 : f32
    %31 = vector.broadcast %cst_15 : f32 to vector<24x128xf32>
    %32 = arith.subf %17, %16 : vector<24x128xf32>
    %33 = arith.mulf %32, %32 : vector<24x128xf32>
    %cst_16 = arith.constant -2.000000e+02 : f32
    %34 = vector.broadcast %cst_16 : f32 to vector<24x128xf32>
    %35 = arith.mulf %33, %34 : vector<24x128xf32>
    %36 = math.exp %35 : vector<24x128xf32>
    %37 = arith.mulf %36, %17 : vector<24x128xf32>
    %38 = arith.addf %30, %37 : vector<24x128xf32>
    %39 = arith.addf %31, %36 : vector<24x128xf32>
    %40 = arith.subf %18, %16 : vector<24x128xf32>
    %41 = arith.mulf %40, %40 : vector<24x128xf32>
    %cst_17 = arith.constant -2.000000e+02 : f32
    %42 = vector.broadcast %cst_17 : f32 to vector<24x128xf32>
    %43 = arith.mulf %41, %42 : vector<24x128xf32>
    %44 = math.exp %43 : vector<24x128xf32>
    %45 = arith.mulf %44, %18 : vector<24x128xf32>
    %46 = arith.addf %38, %45 : vector<24x128xf32>
    %47 = arith.addf %39, %44 : vector<24x128xf32>
    %48 = arith.subf %21, %16 : vector<24x128xf32>
    %49 = arith.mulf %48, %48 : vector<24x128xf32>
    %cst_18 = arith.constant -2.000000e+02 : f32
    %50 = vector.broadcast %cst_18 : f32 to vector<24x128xf32>
    %51 = arith.mulf %49, %50 : vector<24x128xf32>
    %52 = math.exp %51 : vector<24x128xf32>
    %53 = arith.mulf %52, %21 : vector<24x128xf32>
    %54 = arith.addf %46, %53 : vector<24x128xf32>
    %55 = arith.addf %47, %52 : vector<24x128xf32>
    %56 = arith.subf %22, %16 : vector<24x128xf32>
    %57 = arith.mulf %56, %56 : vector<24x128xf32>
    %cst_19 = arith.constant -2.000000e+02 : f32
    %58 = vector.broadcast %cst_19 : f32 to vector<24x128xf32>
    %59 = arith.mulf %57, %58 : vector<24x128xf32>
    %60 = math.exp %59 : vector<24x128xf32>
    %61 = arith.mulf %60, %22 : vector<24x128xf32>
    %62 = arith.addf %54, %61 : vector<24x128xf32>
    %63 = arith.addf %55, %60 : vector<24x128xf32>
    %cst_20 = arith.constant 9.998000e-01 : f32
    %64 = vector.broadcast %cst_20 : f32 to vector<24x128xf32>
    %65 = arith.mulf %64, %62 : vector<24x128xf32>
    %66 = arith.addf %16, %65 : vector<24x128xf32>
    %cst_21 = arith.constant 9.998000e-01 : f32
    %67 = vector.broadcast %cst_21 : f32 to vector<24x128xf32>
    %68 = arith.mulf %67, %63 : vector<24x128xf32>
    %69 = arith.addf %29, %68 : vector<24x128xf32>
    %cst_22 = arith.constant 0.000000e+00 : f32
    %70 = vector.broadcast %cst_22 : f32 to vector<24x128xf32>
    %cst_23 = arith.constant 0.000000e+00 : f32
    %71 = vector.broadcast %cst_23 : f32 to vector<24x128xf32>
    %72 = arith.subf %25, %16 : vector<24x128xf32>
    %73 = arith.mulf %72, %72 : vector<24x128xf32>
    %cst_24 = arith.constant -2.000000e+02 : f32
    %74 = vector.broadcast %cst_24 : f32 to vector<24x128xf32>
    %75 = arith.mulf %73, %74 : vector<24x128xf32>
    %76 = math.exp %75 : vector<24x128xf32>
    %77 = arith.mulf %76, %25 : vector<24x128xf32>
    %78 = arith.addf %70, %77 : vector<24x128xf32>
    %79 = arith.addf %71, %76 : vector<24x128xf32>
    %80 = arith.subf %26, %16 : vector<24x128xf32>
    %81 = arith.mulf %80, %80 : vector<24x128xf32>
    %cst_25 = arith.constant -2.000000e+02 : f32
    %82 = vector.broadcast %cst_25 : f32 to vector<24x128xf32>
    %83 = arith.mulf %81, %82 : vector<24x128xf32>
    %84 = math.exp %83 : vector<24x128xf32>
    %85 = arith.mulf %84, %26 : vector<24x128xf32>
    %86 = arith.addf %78, %85 : vector<24x128xf32>
    %87 = arith.addf %79, %84 : vector<24x128xf32>
    %88 = arith.subf %27, %16 : vector<24x128xf32>
    %89 = arith.mulf %88, %88 : vector<24x128xf32>
    %cst_26 = arith.constant -2.000000e+02 : f32
    %90 = vector.broadcast %cst_26 : f32 to vector<24x128xf32>
    %91 = arith.mulf %89, %90 : vector<24x128xf32>
    %92 = math.exp %91 : vector<24x128xf32>
    %93 = arith.mulf %92, %27 : vector<24x128xf32>
    %94 = arith.addf %86, %93 : vector<24x128xf32>
    %95 = arith.addf %87, %92 : vector<24x128xf32>
    %96 = arith.subf %28, %16 : vector<24x128xf32>
    %97 = arith.mulf %96, %96 : vector<24x128xf32>
    %cst_27 = arith.constant -2.000000e+02 : f32
    %98 = vector.broadcast %cst_27 : f32 to vector<24x128xf32>
    %99 = arith.mulf %97, %98 : vector<24x128xf32>
    %100 = math.exp %99 : vector<24x128xf32>
    %101 = arith.mulf %100, %28 : vector<24x128xf32>
    %102 = arith.addf %94, %101 : vector<24x128xf32>
    %103 = arith.addf %95, %100 : vector<24x128xf32>
    %cst_28 = arith.constant 0.999600052 : f32
    %104 = vector.broadcast %cst_28 : f32 to vector<24x128xf32>
    %105 = arith.mulf %104, %102 : vector<24x128xf32>
    %106 = arith.addf %66, %105 : vector<24x128xf32>
    %cst_29 = arith.constant 0.999600052 : f32
    %107 = vector.broadcast %cst_29 : f32 to vector<24x128xf32>
    %108 = arith.mulf %107, %103 : vector<24x128xf32>
    %109 = arith.addf %69, %108 : vector<24x128xf32>
    %cst_30 = arith.constant 0.000000e+00 : f32
    %110 = vector.broadcast %cst_30 : f32 to vector<24x128xf32>
    %cst_31 = arith.constant 0.000000e+00 : f32
    %111 = vector.broadcast %cst_31 : f32 to vector<24x128xf32>
    %112 = arith.subf %19, %16 : vector<24x128xf32>
    %113 = arith.mulf %112, %112 : vector<24x128xf32>
    %cst_32 = arith.constant -2.000000e+02 : f32
    %114 = vector.broadcast %cst_32 : f32 to vector<24x128xf32>
    %115 = arith.mulf %113, %114 : vector<24x128xf32>
    %116 = math.exp %115 : vector<24x128xf32>
    %117 = arith.mulf %116, %19 : vector<24x128xf32>
    %118 = arith.addf %110, %117 : vector<24x128xf32>
    %119 = arith.addf %111, %116 : vector<24x128xf32>
    %120 = arith.subf %20, %16 : vector<24x128xf32>
    %121 = arith.mulf %120, %120 : vector<24x128xf32>
    %cst_33 = arith.constant -2.000000e+02 : f32
    %122 = vector.broadcast %cst_33 : f32 to vector<24x128xf32>
    %123 = arith.mulf %121, %122 : vector<24x128xf32>
    %124 = math.exp %123 : vector<24x128xf32>
    %125 = arith.mulf %124, %20 : vector<24x128xf32>
    %126 = arith.addf %118, %125 : vector<24x128xf32>
    %127 = arith.addf %119, %124 : vector<24x128xf32>
    %128 = arith.subf %23, %16 : vector<24x128xf32>
    %129 = arith.mulf %128, %128 : vector<24x128xf32>
    %cst_34 = arith.constant -2.000000e+02 : f32
    %130 = vector.broadcast %cst_34 : f32 to vector<24x128xf32>
    %131 = arith.mulf %129, %130 : vector<24x128xf32>
    %132 = math.exp %131 : vector<24x128xf32>
    %133 = arith.mulf %132, %23 : vector<24x128xf32>
    %134 = arith.addf %126, %133 : vector<24x128xf32>
    %135 = arith.addf %127, %132 : vector<24x128xf32>
    %136 = arith.subf %24, %16 : vector<24x128xf32>
    %137 = arith.mulf %136, %136 : vector<24x128xf32>
    %cst_35 = arith.constant -2.000000e+02 : f32
    %138 = vector.broadcast %cst_35 : f32 to vector<24x128xf32>
    %139 = arith.mulf %137, %138 : vector<24x128xf32>
    %140 = math.exp %139 : vector<24x128xf32>
    %141 = arith.mulf %140, %24 : vector<24x128xf32>
    %142 = arith.addf %134, %141 : vector<24x128xf32>
    %143 = arith.addf %135, %140 : vector<24x128xf32>
    %cst_36 = arith.constant 0.999200344 : f32
    %144 = vector.broadcast %cst_36 : f32 to vector<24x128xf32>
    %145 = arith.mulf %144, %142 : vector<24x128xf32>
    %146 = arith.addf %106, %145 : vector<24x128xf32>
    %cst_37 = arith.constant 0.999200344 : f32
    %147 = vector.broadcast %cst_37 : f32 to vector<24x128xf32>
    %148 = arith.mulf %147, %143 : vector<24x128xf32>
    %149 = arith.addf %109, %148 : vector<24x128xf32>
    %150 = tpu.reciprocal %149 {approx = true} : vector<24x128xf32> -> vector<24x128xf32>
    %151 = arith.mulf %149, %150 : vector<24x128xf32>
    %cst_38 = arith.constant 2.000000e+00 : f32
    %152 = vector.broadcast %cst_38 : f32 to vector<24x128xf32>
    %153 = arith.subf %152, %151 : vector<24x128xf32>
    %154 = arith.mulf %150, %153 : vector<24x128xf32>
    %155 = arith.mulf %146, %154 : vector<24x128xf32>
    %156 = vector.extract_strided_slice %155 {offsets = [0, 0], sizes = [16, 128], strides = [1, 1]} : vector<24x128xf32> to vector<16x128xf32>
    %c0_39 = arith.constant 0 : index
    %c0_40 = arith.constant 0 : index
    %c0_41 = arith.constant 0 : index
    %157 = vector.load %arg2[%c0_39, %c0_40, %c0_41] : memref<1x16x128xf32, #tpu.memory_space<vmem>>, vector<1x16x128xf32>
    %158 = vector.shape_cast %157 : vector<1x16x128xf32> to vector<16x128xf32>
    %159 = vector.shape_cast %156 : vector<16x128xf32> to vector<1x16x128xf32>
    tpu.vector_store %arg2[%c0_39, %c0_40, %c0_41], %159 {strides = array<i32>} : memref<1x16x128xf32, #tpu.memory_space<vmem>>, vector<1x16x128xf32>,
    return
  }
  func.func @transform_0(%arg0: i32) -> (i32, i32, i32) {
    %c0_i32 = arith.constant 0 : i32
    %c0_i32_0 = arith.constant 0 : i32
    %c0_i32_1 = arith.constant 0 : i32
    return %arg0, %c0_i32, %c0_i32_0 : i32, i32, i32
  }
  func.func @transform_1(%arg0: i32) -> (i32, i32, i32) {
    %c0_i32 = arith.constant 0 : i32
    %c0_i32_0 = arith.constant 0 : i32
    %c0_i32_1 = arith.constant 0 : i32
    return %arg0, %c0_i32, %c0_i32_0 : i32, i32, i32
  }
}

</mosaic_0001>

<bundles_post_ra>
// kernel: tpu_custom_call.1
= control target key start
LH: loop header
LB: loop body
LE: loop exit
PB: predicated region body
PF: predicated region fallthrough
CT: control target
= control target key end

     0   :  { %6 = vsyncpa [#allocation3], 0  ;;  %s1190_s0 = inlined_call_operand.hbm [shape: f32[2,24,128], index: 0, kind: input, shape index: {}]   ;;  %s1191_s1 = inlined_call_operand.hbm [shape: f32[2,16,128], index: 1, kind: output, shape index: {}]  }
   0x1   :  { %8 = vsyncpa [#allocation3 + $0x1], 0 }
   0x2   :  { %9 = vsyncpa [#allocation4], 0 }
   0x3   :  { %11 = vsyncpa [#allocation4 + $0x1], 0  ;;  %s809_s6 = smov 0   ;;  %s811_s7 = smov 0  }
   0x4   :  { %s813_s8 = smov 0   ;;  %s815_s9 = smov 0  }
   0x5 LB: > { %s830_s10 = sadd.s32 4294967295, %s787_s9   ;;  %s564_s11 = sadd.s32 4294967294, %s787_s9   ;;  %s787_s9 = sphi %s815_s9, %s1206_s9   ;;  %s783_s8 = sphi %s813_s8, %s1205_s8   ;;  %s779_s7 = sphi %s811_s7, %s1204_s7   ;;  %s775_s6 = sphi %s809_s6, %s1203_s6  }
   0x6   : > { %s834_s12 = sadd.s32 1, %s787_s9   ;;  %s24_s13 = sadd.s32 1, %s783_s8 }
   0x7   : > { %s21_s14 = ssub.s32 %s787_s9, %s834_s12  ;;  %p31_p0 = scmp.ne.s32.totalorder %s783_s8, %s779_s7 }
   0x8   : > { %p22_p1 = scmp.eq.s32.totalorder %s21_s14, 0  ;;  %p32_p2 = scmp.eq.s32.totalorder %s787_s9, 0 }
   0x9   : > { %p37_p3 = scmp.ne.s32.totalorder %s779_s7, %s775_s6  ;;  %p38_p4 = scmp.eq.s32.totalorder %s830_s10, 0 }
   0xa   : > { %s846_s15 = scalar_select %p22_p1, %s783_s8, %s24_s13  }
   0xb   : > { %p33_p5 = por %p32_p2, %p31_p0  ;;  %p848_p6 = por %p38_p4, %p37_p3 }
   0xc   : > { %p61_p7 = scmp.eq.s32.totalorder %s830_s10, 1  ;;  %p67_p8 = scmp.eq.s32.totalorder %s564_s11, 1 }
   0xd   : > { %p591_p10 = scmp.lt.s32.totalorder %s787_s9, 2  ;;  %s87_s19 = sand.u32 1, %s783_s8  }
   0xe   : > { %p855_p11 = por %p61_p7, %p31_p0  ;;  %p859_p12 = por %p67_p8, %p37_p3 }
   0xf   : > { %s577_s20 = smul.u32 384, %s787_s9  ;;  %p870_p13 = pnand %p591_p10, %p33_p5 }
  0x10   : > { %s1195_s17 = scalar_select %p855_p11, 1, 0 }
  0x11   : > { %s1196_s18 = scalar_select %p859_p12, 1, 0 }
  0x12   : > { %s576_s21 = smul.u32 24, %s87_s19  ;;  %s868_s24 = scalar_lea.hbm %s1190_s0, %s577_s20 }
  0x13   : > { %s876_s28 = scalar_lea.sflag [#allocation3], %s87_s19  ;;  %s691_s29 = scalar_lea.hbm %s868_s24, 384 }
  0x14   : > { %s91_s26 = scalar_lea.vmem [#allocation2], %s576_s21  ;;  %p692_p0 = scmp.ne.s32.totalorder %s868_s24, %s691_s29 }
  0x15   : > { %s98_s27 = sshll.u32 %s91_s26, 4  ;;  %p693_p1 = pneg %p870_p13  ;;  %s874_s27 = int_to_ptr.vmem [resolvable:$true] %s98_s27 }
  0x16   : > { %s696_s3 = scalar_lea.hbm %s1190_s0, 768  ;;  %p697_p4 = scmp.lt.u32.totalorder %s868_s24, %s1190_s0 }
  0x17   : > { %p694_p2 = pnand %p693_p1, %p692_p0  ;;  %p698_p5 = scmp.lt.u32.totalorder %s696_s3, %s691_s29 }
  0x18   : > { %p700_p8 = scmp.lt.u32.totalorder %s691_s29, %s868_s24 }
  0x19   : > { %p695_p3 = pneg %p694_p2  ;;  %p699_p7 = por %p698_p5, %p697_p4 }
  0x1b   : > { %p701_p10 = por %p700_p8, %p699_p7 }
  0x1d   : > { %p702_p9 = pnand %p701_p10, %p695_p3 }
  0x1f   : > { %705 = shalt.err (!%p702_p9)
}
  0x20   : > { %s706_s11 = scalar_lea.vmem %s874_s27, 384  ;;  %s789_s13 = smov [#allocation2]  }
  0x21   : > { %p707_p0 = scmp.ne.s32.totalorder %s874_s27, %s706_s11  ;;  %s711_s14 = sshll.u32 %s789_s13, 4  ;;  %s712_s14 = int_to_ptr.vmem [resolvable:$false] %s711_s14 }
  0x22   : > { %s713_s19 = scalar_lea.vmem %s712_s14, 768  ;;  %p714_p11 = scmp.lt.s32.totalorder %s874_s27, %s712_s14 }
  0x23   : > { %p709_p2 = pnand %p707_p0, %p693_p1  ;;  %p715_p4 = scmp.lt.s32.totalorder %s713_s19, %s706_s11 }
  0x25   : > { %p710_p12 = pneg %p709_p2  ;;  %p716_p5 = por %p715_p4, %p714_p11 }
  0x27   : > { %p717_p7 = pnand %p716_p5, %p710_p12 }
  0x29   : > { %720 = shalt.err (!%p717_p7)
}
  0x2a   : > { %s790_s20 = smov 128   ;;  %s791_s21 = smov 8  }
  0x2b   : > { %586 = dma.hbm_to_vmem [thread:$0]  (!%p870_p13), %s868_s24, 384, %s874_s27, %s876_s28, %s790_s20, %s790_s20, %s791_s21  }
  0x2c   : > { %p568_p9 = scmp.ge.s32.totalorder %s787_s9, 1  ;;  %p106_p1 = scmp.lt.s32.totalorder %s787_s9, 3 }
  0x2e   : > { %p107_p3 = pnand %p568_p9, %p106_p1 }
  0x30   : > { %110 = sbr.rel (%p107_p3) target bundleno = 292 (0x124), region = 24 }
  0x37   : > { %s907_s22 = sand.u32 1, %s779_s7  }
  0x38   : > { %s578_s23 = smul.u32 24, %s907_s22  ;;  %s113_s26 = scalar_lea.sflag [#allocation3], %s907_s22 }
  0x3a   : > { %s116_s29 = scalar_lea.vmem [#allocation2], %s578_s23 }
  0x3b   : > { %766 = dma.done.wait (%p848_p6), %s113_s26, 384  }
  0x3c   : > { %768 = vsyncadd (%p848_p6), %s113_s26, 4294966912  ;;  %v135_v0 = vld [vmem:[%s116_s29] sm:$0xff]  ;;  %v136_v1 = vld [vmem:[%s116_s29 + $0x8] sm:$0xff]  ;;  %s792_s16 = smov 1   ;;  %s793_s24 = smov 127   ;;  %v206_v42 = vlaneseq }
  0x3d   : > { %v137_v2 = vld [vmem:[%s116_s29 + $0x10] sm:$0xff]  ;;  %v138_v3 = vadd.f32 1.0, %v135_v0  ;;  %v139_v4 = vadd.f32 1.0, %v136_v1  ;;  %s794_s25 = smov 2   ;;  %s795_s27 = smov 126  }
  0x3e   : > { %v140_v5 = vadd.f32 1.0, %v137_v2  ;;  %v927_v43 = vshrl.u32 %v206_v42, 7  ;;  %s569_s28 = sshll.u32 %s907_s22, 4  ;;  %s575_s30 = sshll.u32 %s830_s10, 8 }
  0x3f   : > { %v141_v6 = vmul.f32 0.5, %v138_v3  ;;  %v142_v7 = vmul.f32 0.5, %v139_v4  ;;  %s134_s2 = scalar_lea.vmem [#allocation5], %s569_s28  ;;  %s1144_s11 = scalar_lea.hbm %s1191_s1, %s575_s30 }
  0x40   : > { %v143_v8 = vmul.f32 0.5, %v140_v5  ;;  %vm214_vm6 = vcmp.lt.s32.totalorder %v927_v43, 7  ;;  %vm208_vm7 = vcmp.lt.s32.totalorder %v927_v43, 1  ;;  %vm220_vm8 = vcmp.lt.s32.totalorder %v927_v43, 2  ;;  %s491_s3 = sshll.u32 %s134_s2, 4  ;;  %s478_s13 = scalar_lea.sflag [#allocation4], %s907_s22  ;;  %s1146_s3 = int_to_ptr.vmem [resolvable:$true] %s491_s3 }
  0x41   : > { %v144_v9 = vmax.f32 %v141_v6, 1e-06  ;;  %v145_v10 = vmax.f32 %v142_v7, 1e-06  ;;  %vm226_vm9 = vcmp.lt.s32.totalorder %v927_v43, 6  ;;  %s721_s10 = scalar_lea.vmem %s1146_s3, 256 }
  0x42   : > { %v146_v11 = vmax.f32 %v143_v8, 1e-06  ;;  %p722_p6 = scmp.ne.s32.totalorder %s1146_s3, %s721_s10  ;;  %p1200_p11 = scmp.ne.s32.totalorder %s1195_s17, 0 }
  0x43   : > { %v147_v12 = vmin.f32 %v144_v9, 1.0  ;;  %v148_v13 = vmin.f32 %v145_v10, 1.0  ;;  %s796_s14 = smov [#allocation5]  }
  0x44   : > { %v149_v14 = vmin.f32 %v146_v11, 1.0  ;;  %p723_p12 = pnand %p722_p6, %p1200_p11  ;;  %s725_s19 = sshll.u32 %s796_s14, 4  ;;  %s726_s19 = int_to_ptr.vmem [resolvable:$false] %s725_s19 }
  0x45   : > { %633 = vrsqrt.f32 %v147_v12  ;;  %vm155_vm0 = vcmp.eq.f32.partialorder %v147_v12, inf  ;;  %v158_v16 = vand.u32 2147483648, %v147_v12  ;;  %vm157_vm1 = vcmp.eq.f32.partialorder %v147_v12, 0.0  ;;  %s727_s20 = scalar_lea.vmem %s726_s19, 512  ;;  %p728_p8 = scmp.lt.s32.totalorder %s1146_s3, %s726_s19 }
  0x46   : > { %635 = vrsqrt.f32 %v148_v13  ;;  %vm162_vm2 = vcmp.eq.f32.partialorder %v148_v13, inf  ;;  %v165_v19 = vand.u32 2147483648, %v148_v13  ;;  %vm164_vm3 = vcmp.eq.f32.partialorder %v148_v13, 0.0  ;;  %p724_p13 = pneg %p723_p12  ;;  %p729_p10 = scmp.lt.s32.totalorder %s727_s20, %s721_s10 }
  0x47   : > { %637 = vrsqrt.f32 %v149_v14  ;;  %vm169_vm4 = vcmp.eq.f32.partialorder %v149_v14, inf  ;;  %v172_v22 = vand.u32 2147483648, %v149_v14  ;;  %vm171_vm5 = vcmp.eq.f32.partialorder %v149_v14, 0.0 }
  0x48   : > { %v150_v27 = vmul.f32 0.6, %v147_v12  ;;  %v151_v33 = vmul.f32 0.6, %v148_v13  ;;  %v152_v35 = vmul.f32 0.6, %v149_v14  ;;  %p730_p0 = por %p729_p10, %p728_p8 }
  0x4a   : > { %p731_p2 = pnand %p730_p0, %p724_p13 }
  0x4f   : > { %v634_v15 = vpop.eup %633 }
  0x50   : > { %v636_v17 = vpop.eup %635  ;;  %v154_v18 = vmul.f32 %v634_v15, %v147_v12 }
  0x51   : > { %v638_v20 = vpop.eup %637  ;;  %v161_v21 = vmul.f32 %v636_v17, %v148_v13 }
  0x52   : > { %v156_v23 = vsel %vm155_vm0, %v147_v12, %v154_v18  ;;  %v168_v24 = vmul.f32 %v638_v20, %v149_v14 }
  0x53   : > { %v159_v25 = vsel %vm157_vm1, %v158_v16, %v156_v23  ;;  %v163_v26 = vsel %vm162_vm2, %v148_v13, %v161_v21 }
  0x54   : > { %v166_v28 = vsel %vm164_vm3, %v165_v19, %v163_v26  ;;  %v174_v29 = vmul.f32 %v159_v25, %v147_v12  ;;  %v170_v30 = vsel %vm169_vm4, %v149_v14, %v168_v24 }
  0x55   : > { %v175_v31 = vmul.f32 %v166_v28, %v148_v13  ;;  %v173_v32 = vsel %vm171_vm5, %v172_v22, %v170_v30 }
  0x56   : > { %v177_v34 = vmul.f32 0.4, %v174_v29  ;;  %v176_v36 = vmul.f32 %v173_v32, %v149_v14 }
  0x57   : > { %v178_v37 = vmul.f32 0.4, %v175_v31 }
  0x58   : > { %v915_v38 = vadd.f32 %v177_v34, %v150_v27  ;;  %v179_v39 = vmul.f32 0.4, %v176_v36 }
  0x59   : > { %v917_v40 = vadd.f32 %v178_v37, %v151_v33 }
  0x5a   : > { %1198 = vst [vmem:[#allocation8_spill] sm:$0xff] %v915_v38  ;;  %v182_v41 = vadd.f32 %v179_v39, %v152_v35  ;;  %183 = vrot.lane.b32.xlu0 %v915_v38, %s792_s16  ;;  %v211_v45 = vrot.slane %v915_v38, 1  ;;  %v203_v47 = vrot.slane %v915_v38, 7  ;;  %v217_v60 = vrot.slane %v915_v38, 6 }
  0x5b   : > { %v212_v44 = vrot.slane %v917_v40, 1  ;;  %v204_v50 = vrot.slane %v917_v40, 7  ;;  %v218_v59 = vrot.slane %v917_v40, 6  ;;  %v224_v61 = vrot.slane %v917_v40, 2 }
  0x5c   : > { %187 = vrot.lane.b32.xlu1 %v182_v41, %s792_s16  ;;  %v205_v46 = vrot.slane %v182_v41, 7  ;;  %v213_v48 = vrot.slane %v182_v41, 1  ;;  %v225_v62 = vrot.slane %v182_v41, 2  ;;  %v219_v63 = vrot.slane %v182_v41, 6 }
  0x5d   : > { %v935_v49 = vsel %vm214_vm6, %v211_v45, %v212_v44  ;;  %v951_v54 = vsel %vm208_vm7, %v203_v47, %v204_v50  ;;  %v964_v2 = vsel %vm220_vm8, %v217_v60, %v218_v59  ;;  %v223_v15 = vrot.slane %v915_v38, 2 }
  0x5e   : > { %185 = vrot.lane.b32.xlu0 %v917_v40, %s792_s16  ;;  %v941_v51 = vsel %vm208_vm7, %v205_v46, %v203_v47  ;;  %v297_v52 = vsub.f32 %v935_v49, %v915_v38  ;;  %v947_v53 = vsel %vm214_vm6, %v212_v44, %v213_v48  ;;  %v282_v58 = vsub.f32 %v951_v54, %v917_v40 }
  0x5f   : > { %v281_v55 = vsub.f32 %v941_v51, %v915_v38  ;;  %v298_v56 = vsub.f32 %v947_v53, %v917_v40  ;;  %v968_v5 = vsel %vm226_vm9, %v224_v61, %v225_v62  ;;  %v970_v6 = vsel %vm220_vm8, %v219_v63, %v217_v60 }
  0x60   : > { %189 = vrot.lane.b32.xlu1 %v915_v38, %s793_s24  ;;  %v299_v57 = vmul.f32 %v297_v52, %v297_v52  ;;  %v284_v4 = vmul.f32 %v282_v58, %v282_v58  ;;  %v426_v9 = vsub.f32 %v964_v2, %v917_v40  ;;  %v442_v10 = vsub.f32 %v968_v5, %v917_v40 }
  0x61   : > { %v283_v0 = vmul.f32 %v281_v55, %v281_v55  ;;  %v300_v1 = vmul.f32 %v298_v56, %v298_v56  ;;  %v425_v11 = vsub.f32 %v970_v6, %v915_v38  ;;  %v986_v24 = vsel %vm226_vm9, %v223_v15, %v224_v61 }
  0x62   : > { %191 = vrot.lane.b32.xlu0 %v917_v40, %s793_s24  ;;  %v301_v3 = vmul.f32 -200.0, %v299_v57  ;;  %v286_v13 = vmul.f32 -200.0, %v284_v4  ;;  %v428_v17 = vmul.f32 %v426_v9, %v426_v9  ;;  %v444_v18 = vmul.f32 %v442_v10, %v442_v10 }
  0x63   : > { %v285_v7 = vmul.f32 -200.0, %v283_v0  ;;  %v302_v8 = vmul.f32 -200.0, %v300_v1  ;;  %v427_v19 = vmul.f32 %v425_v11, %v425_v11  ;;  %v992_v32 = vsub.f32 %v986_v24, %v915_v38 }
  0x64   : > { %193 = vrot.lane.b32.xlu1 %v182_v41, %s793_s24  ;;  %v303_v12 = vmul.f32 1.442695, %v301_v3  ;;  %v289_v21 = vmul.f32 1.442695, %v286_v13  ;;  %v430_v26 = vmul.f32 -200.0, %v428_v17  ;;  %v446_v29 = vmul.f32 -200.0, %v444_v18 }
  0x65   : > { %v287_v14 = vmul.f32 1.442695, %v285_v7  ;;  %v305_v16 = vmul.f32 1.442695, %v302_v8  ;;  %v429_v30 = vmul.f32 -200.0, %v427_v19 }
  0x66   : > { %195 = vrot.lane.b32.xlu0 %v915_v38, %s794_s25  ;;  %639 = vpow2.f32 %v303_v12  ;;  %v449_v46 = vmul.f32 1.442695, %v446_v29  ;;  %v433_v47 = vmul.f32 1.442695, %v430_v26 }
  0x67   : > { %641 = vpow2.f32 %v287_v14  ;;  %v431_v48 = vmul.f32 1.442695, %v429_v30 }
  0x68   : > { %197 = vrot.lane.b32.xlu1 %v917_v40, %s794_s25  ;;  %643 = vpow2.f32 %v305_v16 }
  0x69   : > { %645 = vpow2.f32 %v289_v21 }
  0x6a   : > { %199 = vrot.lane.b32.xlu0 %v915_v38, %s795_s27  ;;  %647 = vpow2.f32 %v433_v47 }
  0x6b   : > { %649 = vpow2.f32 %v431_v48 }
  0x6c   : > { %201 = vrot.lane.b32.xlu1 %v917_v40, %s795_s27  ;;  %651 = vpow2.f32 %v449_v46 }
  0x70   : > { %v1025_v62 = vpop.eup %639 }
  0x71   : > { %v1032_v7 = vpop.eup %641 }
  0x72   : > { %v1035_v12 = vpop.eup %643 }
  0x73   : > { %v1041_v19 = vpop.eup %645 }
  0xcc   : > { %v979_v20 = vpop.permute.xlu0 %183 }
  0xcd   : > { %v229_v22 = vrot.slane %v979_v20, 7  ;;  %v249_v23 = vsub.f32 %v979_v20, %v915_v38  ;;  %v239_v39 = vrot.slane %v979_v20, 1 }
  0xce   : > { %v188_v25 = vpop.permute.xlu1 %187 }
  0xcf   : > { %v231_v27 = vrot.slane %v188_v25, 7  ;;  %v251_v28 = vmul.f32 %v249_v23, %v249_v23  ;;  %v241_v37 = vrot.slane %v188_v25, 1 }
  0xd0   : > { %v988_v31 = vpop.permute.xlu0 %185 }
  0xd1   : > { %v996_v33 = vsel %vm208_vm7, %v231_v27, %v229_v22  ;;  %v253_v34 = vmul.f32 -200.0, %v251_v28  ;;  %v230_v35 = vrot.slane %v988_v31, 7  ;;  %v240_v36 = vrot.slane %v988_v31, 1 }
  0xd2   : > { %v321_v41 = vsub.f32 %v996_v33, %v915_v38  ;;  %v1003_v42 = vpop.permute.xlu1 %189  ;;  %v250_v44 = vsub.f32 %v988_v31, %v917_v40 }
  0xd3   : > { %v265_v45 = vsub.f32 %v1003_v42, %v915_v38  ;;  %v1011_v52 = vsel %vm208_vm7, %v229_v22, %v230_v35  ;;  %v1015_v55 = vsel %vm214_vm6, %v240_v36, %v241_v37  ;;  %v1019_v56 = vsel %vm214_vm6, %v239_v39, %v240_v36 }
  0xd4   : > { %v323_v50 = vmul.f32 %v321_v41, %v321_v41  ;;  %v1021_v57 = vpop.permute.xlu0 %191  ;;  %v255_v58 = vmul.f32 1.442695, %v253_v34  ;;  %v252_v60 = vmul.f32 %v250_v44, %v250_v44  ;;  %v322_v61 = vsub.f32 %v1011_v52, %v917_v40 }
  0xd5   : > { %v267_v59 = vmul.f32 %v265_v45, %v265_v45  ;;  %v234_v0 = vrot.slane %v1003_v42, 7  ;;  %v353_v1 = vsub.f32 %v1019_v56, %v915_v38  ;;  %v354_v3 = vsub.f32 %v1015_v55, %v917_v40 }
  0xd6   : > { %v325_v63 = vmul.f32 -200.0, %v323_v50  ;;  %v194_v4 = vpop.permute.xlu1 %193  ;;  %v324_v9 = vmul.f32 %v322_v61, %v322_v61  ;;  %v235_v11 = vrot.slane %v1021_v57, 7  ;;  %v254_v14 = vmul.f32 -200.0, %v252_v60 }
  0xd7   : > { %v269_v8 = vmul.f32 -200.0, %v267_v59  ;;  %v236_v10 = vrot.slane %v194_v4, 7  ;;  %v355_v15 = vmul.f32 %v353_v1, %v353_v1  ;;  %v356_v16 = vmul.f32 %v354_v3, %v354_v3 }
  0xd8   : > { %v327_v13 = vmul.f32 1.442695, %v325_v63  ;;  %v246_v18 = vrot.slane %v194_v4, 1  ;;  %v244_v21 = vrot.slane %v1003_v42, 1  ;;  %653 = vpow2.f32 %v255_v58  ;;  %v1053_v29 = vpop.permute.xlu0 %195 }
  0xd9   : > { %v1039_v17 = vsel %vm208_vm7, %v236_v10, %v234_v0  ;;  %v271_v22 = vmul.f32 1.442695, %v269_v8  ;;  %v326_v26 = vmul.f32 -200.0, %v324_v9  ;;  %v1050_v27 = vsel %vm208_vm7, %v234_v0, %v235_v11  ;;  %v1079_v8 = vpop.eup %647 }
  0xda   : > { %v337_v23 = vsub.f32 %v1039_v17, %v915_v38  ;;  %v1046_v25 = vpop.permute.xlu1 %197  ;;  %v245_v28 = vrot.slane %v1021_v57, 1  ;;  %655 = vpow2.f32 %v327_v13  ;;  %v257_v30 = vmul.f32 1.442695, %v254_v14  ;;  %v1083_v13 = vpop.eup %649 }
  0xdb   : > { %v357_v34 = vmul.f32 -200.0, %v355_v15  ;;  %v358_v36 = vmul.f32 -200.0, %v356_v16  ;;  %v266_v41 = vsub.f32 %v1021_v57, %v917_v40  ;;  %657 = vpow2.f32 %v271_v22 }
  0xdc   : > { %v339_v35 = vmul.f32 %v337_v23, %v337_v23  ;;  %v1057_v37 = vsel %vm214_vm6, %v245_v28, %v246_v18  ;;  %v1061_v39 = vsel %vm214_vm6, %v244_v21, %v245_v28  ;;  %v338_v45 = vsub.f32 %v1050_v27, %v917_v40  ;;  %v1077_v4 = vpop.permute.xlu0 %199  ;;  %v1085_v21 = vpop.eup %651 }
  0xdd   : > { %v369_v46 = vsub.f32 %v1061_v39, %v915_v38  ;;  %v329_v47 = vmul.f32 1.442695, %v326_v26  ;;  %v268_v48 = vmul.f32 %v266_v41, %v266_v41  ;;  %v370_v50 = vsub.f32 %v1057_v37, %v917_v40 }
  0xde   : > { %v341_v44 = vmul.f32 -200.0, %v339_v35  ;;  %v394_v43 = vsub.f32 %v1046_v25, %v917_v40  ;;  %v1073_v58 = vpop.permute.xlu1 %201  ;;  %659 = vpow2.f32 %v257_v30  ;;  %v340_v60 = vmul.f32 %v338_v45, %v338_v45 }
  0xdf   : > { %v371_v61 = vmul.f32 %v369_v46, %v369_v46  ;;  %v270_v63 = vmul.f32 -200.0, %v268_v48  ;;  %v372_v0 = vmul.f32 %v370_v50, %v370_v50  ;;  %v393_v3 = vsub.f32 %v1053_v29, %v915_v38 }
  0xe0   : > { %v343_v59 = vmul.f32 1.442695, %v341_v44  ;;  %v396_v1 = vmul.f32 %v394_v43, %v394_v43  ;;  %v361_v9 = vmul.f32 1.442695, %v358_v36  ;;  %v342_v10 = vmul.f32 -200.0, %v340_v60 }
  0xe1   : > { %v410_v11 = vsub.f32 %v1073_v58, %v917_v40  ;;  %v273_v14 = vmul.f32 1.442695, %v270_v63  ;;  %v374_v15 = vmul.f32 -200.0, %v372_v0  ;;  %v395_v18 = vmul.f32 %v393_v3, %v393_v3 }
  0xe2   : > { %661 = vpow2.f32 %v343_v59  ;;  %v398_v16 = vmul.f32 -200.0, %v396_v1  ;;  %v345_v22 = vmul.f32 1.442695, %v342_v10  ;;  %v409_v26 = vsub.f32 %v1077_v4, %v915_v38  ;;  %v1089_v28 = vpop.eup %653 }
  0xe3   : > { %663 = vpow2.f32 %v329_v47  ;;  %v412_v23 = vmul.f32 %v410_v11, %v410_v11  ;;  %v359_v30 = vmul.f32 1.442695, %v357_v34  ;;  %v373_v35 = vmul.f32 -200.0, %v371_v61 }
  0xe4   : > { %665 = vpow2.f32 %v273_v14  ;;  %v443_v36 = vmul.f32 %v992_v32, %v992_v32  ;;  %v1093_v41 = vpop.eup %655  ;;  %v377_v44 = vmul.f32 1.442695, %v374_v15  ;;  %v401_v45 = vmul.f32 1.442695, %v398_v16 }
  0xe5   : > { %667 = vpow2.f32 %v345_v22  ;;  %v397_v46 = vmul.f32 -200.0, %v395_v18  ;;  %v414_v47 = vmul.f32 -200.0, %v412_v23  ;;  %v411_v48 = vmul.f32 %v409_v26, %v409_v26  ;;  %v658_v50 = vpop.eup %657 }
  0xe6   : > { %669 = vpow2.f32 %v361_v9  ;;  %v375_v43 = vmul.f32 1.442695, %v373_v35  ;;  %v445_v60 = vmul.f32 -200.0, %v443_v36  ;;  %v279_v1 = vadd.f32 %v658_v50, %v1089_v28 }
  0xe7   : > { %671 = vpow2.f32 %v359_v30  ;;  %v417_v59 = vmul.f32 1.442695, %v414_v47  ;;  %v413_v61 = vmul.f32 -200.0, %v411_v48  ;;  %v399_v63 = vmul.f32 1.442695, %v397_v46 }
  0xe8   : > { %v660_v34 = vpop.eup %659  ;;  %673 = vpow2.f32 %v377_v44  ;;  %v447_v3 = vmul.f32 1.442695, %v445_v60  ;;  %v295_v16 = vadd.f32 %v1032_v7, %v279_v1 }
  0xe9   : > { %675 = vpow2.f32 %v401_v45  ;;  %v415_v0 = vmul.f32 1.442695, %v413_v61  ;;  %v260_v1 = vmul.f32 %v660_v34, %v988_v31  ;;  %v259_v31 = vmul.f32 %v1089_v28, %v979_v20 }
  0xea   : > { %677 = vpow2.f32 %v417_v59  ;;  %v311_v47 = vadd.f32 %v1025_v62, %v295_v16 }
  0xeb   : > { %679 = vpow2.f32 %v375_v43 }
  0xec   : > { %v662_v32 = vpop.eup %661  ;;  %681 = vpow2.f32 %v415_v0  ;;  %v291_v0 = vmul.f32 %v1032_v7, %v941_v51  ;;  %v436_v7 = vmul.f32 %v1079_v8, %v964_v2 }
  0xed   : > { %v664_v10 = vpop.eup %663  ;;  %683 = vpow2.f32 %v399_v63  ;;  %v351_v14 = vadd.f32 %v662_v32, %v1093_v41 }
  0xee   : > { %v666_v11 = vpop.eup %665  ;;  %685 = vpow2.f32 %v447_v3  ;;  %v308_v3 = vmul.f32 %v1035_v12, %v947_v53  ;;  %v275_v53 = vmul.f32 %v658_v50, %v1003_v42 }
  0xef   : > { %v668_v9 = vpop.eup %667  ;;  %v280_v15 = vadd.f32 %v666_v11, %v660_v34  ;;  %v276_v43 = vmul.f32 %v666_v11, %v1021_v57  ;;  %v292_v11 = vmul.f32 %v1041_v19, %v951_v54  ;;  %v332_v34 = vmul.f32 %v664_v10, %v1011_v52 }
  0xf0   : > { %v352_v18 = vadd.f32 %v668_v9, %v664_v10  ;;  %v670_v22 = vpop.eup %669  ;;  %v277_v2 = vadd.f32 %v275_v53, %v259_v31 }
  0xf1   : > { %v296_v23 = vadd.f32 %v1041_v19, %v280_v15  ;;  %v672_v26 = vpop.eup %671  ;;  %v278_v57 = vadd.f32 %v276_v43, %v260_v1  ;;  %v347_v19 = vmul.f32 %v662_v32, %v1039_v17  ;;  %v364_v10 = vmul.f32 %v670_v22, %v1015_v55 }
  0xf2   : > { %v368_v30 = vadd.f32 %v670_v22, %v352_v18  ;;  %v674_v35 = vpop.eup %673  ;;  %v367_v36 = vadd.f32 %v672_v26, %v351_v14  ;;  %v293_v1 = vadd.f32 %v291_v0, %v277_v2  ;;  %v435_v55 = vmul.f32 %v1083_v13, %v970_v6 }
  0xf3   : > { %v312_v44 = vadd.f32 %v1035_v12, %v296_v23  ;;  %v676_v45 = vpop.eup %675  ;;  %v294_v20 = vadd.f32 %v292_v11, %v278_v57  ;;  %v452_v22 = vmul.f32 %v1085_v21, %v968_v5 }
  0xf4   : > { %v384_v46 = vadd.f32 %v674_v35, %v368_v30  ;;  %v678_v48 = vpop.eup %677  ;;  %v317_v30 = vmul.f32 0.9998, %v311_v47  ;;  %v404_v42 = vmul.f32 %v676_v45, %v1046_v25  ;;  %v307_v25 = vmul.f32 %v1025_v62, %v935_v49 }
  0xf5   : > { %v318_v59 = vmul.f32 0.9998, %v312_v44  ;;  %v680_v60 = vpop.eup %679  ;;  %v424_v61 = vadd.f32 %v678_v48, %v676_v45  ;;  %v348_v44 = vmul.f32 %v668_v9, %v1050_v27  ;;  %v310_v45 = vadd.f32 %v308_v3, %v294_v20 }
  0xf6   : > { %v682_v63 = vpop.eup %681  ;;  %v383_v14 = vadd.f32 %v680_v60, %v367_v36  ;;  %v390_v23 = vmul.f32 0.99960005, %v384_v46  ;;  %v420_v36 = vmul.f32 %v678_v48, %v1073_v58  ;;  %v319_v47 = vadd.f32 1.0, %v317_v30 }
  0xf7   : > { %v684_v15 = vpop.eup %683  ;;  %v320_v18 = vadd.f32 1.0, %v318_v59  ;;  %v440_v16 = vadd.f32 %v1079_v8, %v424_v61  ;;  %v350_v28 = vadd.f32 %v348_v44, %v332_v34  ;;  %v331_v8 = vmul.f32 %v1093_v41, %v996_v33 }
  0xf8   : > { %v423_v38 = vadd.f32 %v684_v15, %v682_v63  ;;  %v686_v51 = vpop.eup %685  ;;  %v389_v46 = vmul.f32 0.99960005, %v383_v14  ;;  %v419_v58 = vmul.f32 %v682_v63, %v1077_v4  ;;  %v403_v43 = vmul.f32 %v684_v15, %v1053_v29 }
  0xf9   : > { %v456_v12 = vadd.f32 %v1085_v21, %v440_v16  ;;  %v392_v27 = vadd.f32 %v390_v23, %v320_v18  ;;  %v349_v32 = vadd.f32 %v347_v19, %v331_v8  ;;  %v366_v59 = vadd.f32 %v364_v10, %v350_v28 }
  0xfa   : > { %v439_v54 = vadd.f32 %v1083_v13, %v423_v38  ;;  %v422_v38 = vadd.f32 %v420_v36, %v404_v42  ;;  %v391_v48 = vadd.f32 %v389_v46, %v319_v47  ;;  %v363_v33 = vmul.f32 %v672_v26, %v1019_v56 }
  0xfb   : > { %v462_v9 = vmul.f32 0.99920034, %v456_v12  ;;  %v421_v41 = vadd.f32 %v419_v58, %v403_v43  ;;  %v380_v4 = vmul.f32 %v674_v35, %v1057_v37  ;;  %v314_v49 = vmul.f32 0.9998, %v310_v45 }
  0xfc   : > { %v455_v50 = vadd.f32 %v686_v51, %v439_v54  ;;  %v438_v29 = vadd.f32 %v436_v7, %v422_v38  ;;  %v365_v63 = vadd.f32 %v363_v33, %v349_v32  ;;  %v309_v3 = vadd.f32 %v307_v25, %v293_v1 }
  0xfd   : > { %v464_v52 = vadd.f32 %v462_v9, %v392_v27  ;;  %v382_v62 = vadd.f32 %v380_v4, %v366_v59  ;;  %v379_v0 = vmul.f32 %v680_v60, %v1061_v39  ;;  %v437_v14 = vadd.f32 %v435_v55, %v421_v41  ;;  %v1199_v39 = vld [vmem:[#allocation8_spill] sm:$0xff] }
  0xfe   : > { %v461_v17 = vmul.f32 0.99920034, %v455_v50  ;;  %v451_v56 = vmul.f32 %v686_v51, %v986_v24  ;;  %v454_v26 = vadd.f32 %v452_v22, %v438_v29  ;;  %v316_v6 = vadd.f32 %v314_v49, %v917_v40 }
  0xff   : > { %687 = vrcp.f32 %v464_v52  ;;  %v381_v15 = vadd.f32 %v379_v0, %v365_v63  ;;  %v386_v37 = vmul.f32 0.99960005, %v382_v62  ;;  %v313_v35 = vmul.f32 0.9998, %v309_v3 }
 0x100   : > { %v463_v61 = vadd.f32 %v461_v17, %v391_v48  ;;  %v453_v5 = vadd.f32 %v451_v56, %v437_v14  ;;  %v458_v21 = vmul.f32 0.99920034, %v454_v26 }
 0x101   : > { %v385_v23 = vmul.f32 0.99960005, %v381_v15  ;;  %v388_v30 = vadd.f32 %v386_v37, %v316_v6  ;;  %v315_v60 = vadd.f32 %v313_v35, %v1199_v39 }
 0x102   : > { %689 = vrcp.f32 %v463_v61  ;;  %v457_v11 = vmul.f32 0.99920034, %v453_v5 }
 0x103   : > { %v460_v44 = vadd.f32 %v458_v21, %v388_v30  ;;  %v387_v40 = vadd.f32 %v385_v23, %v315_v60 }
 0x105   : > { %v459_v7 = vadd.f32 %v457_v11, %v387_v40 }
 0x109   : > { %v688_v13 = vpop.eup %687 }
 0x10a   : > { %v468_v18 = vmul.f32 %v688_v13, %v464_v52 }
 0x10c   : > { %v690_v16 = vpop.eup %689  ;;  %v470_v57 = vsub.f32 2.0, %v468_v18 }
 0x10d   : > { %v467_v24 = vmul.f32 %v690_v16, %v463_v61 }
 0x10e   : > { %v472_v51 = vmul.f32 %v688_v13, %v470_v57 }
 0x10f   : > { %v469_v31 = vsub.f32 2.0, %v467_v24 }
 0x110   : > { %v474_v53 = vmul.f32 %v472_v51, %v460_v44 }
 0x111   : > { %v471_v12 = vmul.f32 %v690_v16, %v469_v31 }
 0x112   : > { %476 = vst [vmem:[%s134_s2 + $0x8] sm:$0xff] %v474_v53 }
 0x113   : > { %v473_v34 = vmul.f32 %v471_v12, %v459_v7 }
 0x115   : > { %475 = vst [vmem:[%s134_s2] sm:$0xff] %v473_v34 }
 0x116   : > { %734 = shalt.err (!%p731_p2)
}
 0x117   : > { %s735_s21 = scalar_lea.hbm %s1144_s11, 256  ;;  %s739_s29 = scalar_lea.hbm %s1191_s1, 512 }
 0x118   : > { %p736_p4 = scmp.ne.s32.totalorder %s1144_s11, %s735_s21  ;;  %p740_p9 = scmp.lt.u32.totalorder %s1144_s11, %s1191_s1 }
 0x119   : > { %p741_p1 = scmp.lt.u32.totalorder %s739_s29, %s735_s21  ;;  %p743_p6 = scmp.lt.u32.totalorder %s735_s21, %s1144_s11 }
 0x11a   : > { %p737_p5 = pnand %p736_p4, %p1200_p11 }
 0x11b   : > { %p742_p3 = por %p741_p1, %p740_p9 }
 0x11c   : > { %p738_p7 = pneg %p737_p5 }
 0x11d   : > { %p744_p12 = por %p743_p6, %p742_p3 }
 0x11f   : > { %p745_p13 = pnand %p744_p12, %p738_p7 }
 0x121   : > { %748 = shalt.err (!%p745_p13)
}
 0x122   : > { %s797_s25 = smov 128   ;;  %s798_s27 = smov 8  }
 0x123   : > { %581 = dma.vmem_to_hbm [thread:$0]  (%p1200_p11), %s1146_s3, 256, %s1144_s11, %s478_s13, %s797_s25, %s797_s25, %s798_s27  }
 0x124 PF: > { %s506_s28 = sand.u32 1, %s775_s6   ;;  %p1201_p8 = scmp.ne.s32.totalorder %s1196_s18, 0 }
 0x125   : > { %p1202_p10 = scmp.ge.s32.totalorder %s787_s9, 2  ;;  %s507_s30 = scalar_lea.sflag [#allocation4], %s506_s28 }
 0x127   : > { %p588_p0 = pnand %p1202_p10, %p1201_p8 }
 0x129   : > { %770 = dma.done.wait (!%p588_p0), %s507_s30, 256  }
 0x12a   : > { %772 = vsyncadd (!%p588_p0), %s507_s30, 4294967040  ;;  %p14_p2 = scmp.ge.s32.totalorder %s834_s12, 4   ;;  %s1203_s6 = smov %s779_s7 }
 0x12b   : > { %s1204_s7 = smov %s783_s8  ;;  %s1205_s8 = smov %s846_s15 }
 0x12c   : > { %s1206_s9 = smov %s834_s12  ;;  %16 = sbr.rel (!%p14_p2) target bundleno = 5 (0x5), region = 69 }
 0x133   :  { %512 = vsyncpa [#allocation3], 1 }
 0x134   :  { %514 = vsyncpa [#allocation3 + $0x1], 1 }
 0x135   :  { %515 = vsyncpa [#allocation4], 1 }
 0x136   :  { %517 = vsyncpa [#allocation4 + $0x1], 1 }

</bundles_post_ra>
